<compile_context>
chip_gen: v5e
topology: v5e:2x2
jax: 0.10.0
libtpu: 0.0.40
codegen_flags: <defaults>
</compile_context>

<pallas_src>
import functools
import math

import jax
import jax.numpy as jnp
from jax.experimental import pallas as pl
from jax.experimental.pallas import tpu as pltpu


def _round_up(x, m):
    return ((x + m - 1) // m) * m


def _vmem_capacity_bytes():
    """Per-core VMEM capacity; falls back to the v7x-safe 64 MiB."""
    try:
        return int(pltpu.get_tpu_info().vmem_capacity_bytes)
    except Exception:
        return 64 << 20


def _estimate(tm, rows_pad, d_pad):
    return (rows_pad * d_pad * 2          # resident bf16 contrast (single-buffered)
            + 4 * tm * rows_pad * 4       # TM x N f32/bool softmax intermediates
            + 4 * tm * 512                # (TM,1) gid/out blocks (lane-padded, dbl-buf)
            + (2 << 20))                  # slack for compiler internal scratch


def _pick_tile(n_anchor, n_pad, d_pad):
    """Row-tile size + scoped-VMEM request, sized per TPU generation."""
    cap = _vmem_capacity_bytes()
    budget = min(cap - (16 << 20), 100 << 20)   # ~48 MiB on v7x, ~100 MiB on v5e/v6e

    tm = 128
    for cand in (1024, 512, 256, 128):
        rows_pad = max(n_pad, _round_up(n_anchor, cand))
        if _estimate(cand, rows_pad, d_pad) <= budget:
            tm = cand
            break
    # Don't over-pad tiny anchor counts, and keep >=2 balanced grid steps so
    # both of v7x's TensorCores get work (harmless on single-TC v5e/v6e).
    tm = min(tm, _round_up(n_anchor, 128))
    if n_anchor > 128:
        tm = min(tm, _round_up(-(-n_anchor // 2), 128))

    rows_pad = max(n_pad, _round_up(n_anchor, tm))
    est = _estimate(tm, rows_pad, d_pad)
    vmem_limit = int(min(max(est + (12 << 20), 32 << 20), cap - (8 << 20)))
    return tm, vmem_limit


def _supcon_kernel(contrast_ref, gid_row_ref, gid_col_ref, out_ref, *,
                   scale, loss_scale_ln2, n_anchor, n_contrast, tm):
    # contrast_ref: [Np, Dp]  bf16  full contrast matrix (constant block, 1-buffered)
    # gid_row_ref:  [TM, 1]   i32   group id per anchor row (-1 on pad rows)
    # gid_col_ref:  [1,  Np]  i32   group id per contrast column (-1 on pad cols)
    # out_ref:      [TM, 1]   f32   per-anchor loss (0 on pad rows)
    i = pl.program_id(0)
    n_cols = contrast_ref.shape[0]

    # Anchor rows are already on-chip inside the contrast block: slice them
    # instead of DMA-ing a separate (scaled) anchor input.
    row0 = pl.multiple_of(i * tm, tm)
    a_rows = contrast_ref[pl.ds(row0, tm), :]                          # [TM, Dp] bf16

    # A @ C^T on the MXU (contract feature axes of both operands; f32 acc).
    # scale = log2(e)/temperature folds the temperature divide and the exp's
    # internal base-2 conversion into one f32 multiply.
    s = jax.lax.dot_general(
        a_rows, contrast_ref[...],
        dimension_numbers=(((1,), (1,)), ((), ())),
        preferred_element_type=jnp.float32) * scale                     # [TM, Np]

    # Masks rebuilt from broadcasted (TM,1)/(1,N) comparisons (VPU, no big iotas).
    row_ids = i * tm + jax.lax.broadcasted_iota(jnp.int32, (tm, 1), 0)  # [TM, 1]
    col_ids = jax.lax.broadcasted_iota(jnp.int32, (1, n_cols), 1)       # [1,  N]
    lmask = jnp.logical_and(row_ids != col_ids, col_ids < n_contrast)   # logits_mask
    pos = jnp.logical_and(gid_row_ref[...] == gid_col_ref[...], lmask)  # positives

    # Numerically stable masked log-softmax in base 2.  Row max over the full
    # row (self / pad cols included) matches the PyTorch reference exactly:
    # the subtracted max cancels in logits - log(sum(exp(logits) * mask)).
    row_max = jnp.max(s, axis=1, keepdims=True)                         # [TM, 1]
    logits2 = s - row_max                                               # base-2 logits
    denom = jnp.sum(jnp.where(lmask, jnp.exp2(logits2), 0.0),
                    axis=1, keepdims=True)                              # [TM, 1]
    pos_dot = jnp.sum(jnp.where(pos, logits2, 0.0), axis=1, keepdims=True)
    pos_sum = jnp.sum(pos, axis=1, keepdims=True).astype(jnp.float32)   # int count

    # mean_log_prob_pos = ln2 * (pos_dot/pos_sum - log2(denom)).
    # Zero-positive anchors (NaN in the PyTorch original; only pad rows in
    # normal use here) are clamped so pad rows stay finite; they are masked
    # out of the mean below.  Exact division (pos_sum is a small exact int).
    mlpp2 = pos_dot / jnp.maximum(pos_sum, 1.0) - jnp.log2(denom)

    row_valid = row_ids < n_anchor                                      # [TM, 1]
    out_ref[...] = jnp.where(row_valid, -loss_scale_ln2 * mlpp2, 0.0)


def supcon_loss_pair(features, labels=None, mask=None,
                     temperature=0.07, contrast_mode='all', base_temperature=0.07):
    """JAX/Pallas equivalent of SupConLoss_pair.forward."""
    if features.ndim < 3:
        raise ValueError('`features` needs to be [bsz, n_views, ...]')
    if features.ndim > 3:
        features = features.reshape(features.shape[0], features.shape[1], -1)
    if labels is not None and mask is not None:
        raise ValueError('Cannot define both `labels` and `mask`')
    if contrast_mode not in ('all', 'one'):
        raise ValueError('Unknown mode: {}'.format(contrast_mode))

    if mask is not None:
        # TODO(synk): arbitrary user-supplied [bsz, bsz] masks cannot be rebuilt
        # in-kernel from group ids; this (rare) path uses the plain-JAX reference.
        return _reference_loss(features, mask=mask, temperature=temperature,
                               contrast_mode=contrast_mode,
                               base_temperature=base_temperature)

    bsz, n_views, dim = features.shape
    features = features.astype(jnp.float32)

    if labels is None:
        gid_base = jnp.arange(bsz, dtype=jnp.int32)           # SimCLR: eye(bsz)
    else:
        labels = jnp.asarray(labels).reshape(-1)
        if labels.shape[0] != bsz:
            raise ValueError('Num of labels does not match num of features')
        gid_base = labels.astype(jnp.int32)

    # contrast_feature = cat(unbind(features, dim=1), dim=0): view-major [N, D]
    n_total = n_views * bsz
    contrast = features.transpose(1, 0, 2).reshape(n_total, dim)
    gid = jnp.tile(gid_base, n_views)                          # [N]

    if contrast_mode == 'all':
        anchor_gid, n_anchor = gid, n_total
    else:  # 'one': anchor = contrast[:bsz], i.e. the first bsz contrast rows
        anchor_gid, n_anchor = gid[:bsz], bsz

    # Pad to lane-dense, (8,128)-aligned shapes; contrast rows also cover the
    # padded anchor range so anchor tiles can be sliced from the contrast block.
    d_pad = _round_up(dim, 128)
    n_pad = _round_up(n_total, 128)
    tm, vmem_limit = _pick_tile(n_anchor, n_pad, d_pad)
    na_pad = _round_up(n_anchor, tm)
    rows_pad = max(n_pad, na_pad)

    contrast_p = jnp.pad(
        contrast, ((0, rows_pad - n_total), (0, d_pad - dim))).astype(jnp.bfloat16)
    gid_col = jnp.pad(gid, (0, rows_pad - n_total),
                      constant_values=-1).reshape(1, rows_pad)
    gid_row = jnp.pad(anchor_gid, (0, na_pad - n_anchor),
                      constant_values=-1).reshape(na_pad, 1)

    kernel = functools.partial(
        _supcon_kernel,
        scale=float(math.log2(math.e) / temperature),
        loss_scale_ln2=float((temperature / base_temperature) * math.log(2.0)),
        n_anchor=int(n_anchor),
        n_contrast=int(n_total),
        tm=int(tm),
    )

    def _run(single_buffer):
        const_kw = {"pipeline_mode": pl.Buffered(1)} if single_buffer else {}
        return pl.pallas_call(
            kernel,
            out_shape=jax.ShapeDtypeStruct((na_pad, 1), jnp.float32),
            grid=(na_pad // tm,),
            in_specs=[
                pl.BlockSpec((rows_pad, d_pad), lambda i: (0, 0), **const_kw),
                pl.BlockSpec((tm, 1), lambda i: (i, 0)),
                pl.BlockSpec((1, rows_pad), lambda i: (0, 0), **const_kw),
            ],
            out_specs=pl.BlockSpec((tm, 1), lambda i: (i, 0)),
            compiler_params=pltpu.CompilerParams(
                dimension_semantics=("parallel",),
                vmem_limit_bytes=int(vmem_limit)),
        )(contrast_p, gid_row, gid_col)

    try:
        # Constant-index blocks don't need double-buffering; single-buffer them.
        per_row = _run(single_buffer=True)
    except Exception:
        # Fallback for jax versions without pipeline_mode / Buffered(1) support.
        per_row = _run(single_buffer=False)

    # Pad rows are emitted as 0 by the kernel; mean over the real anchors.
    return jnp.sum(per_row) / n_anchor


def _reference_loss(features, labels=None, mask=None, temperature=0.07,
                    contrast_mode='all', base_temperature=0.07):
    """Pure-JAX (f32) mirror of the PyTorch SupConLoss_pair.forward."""
    if features.ndim > 3:
        features = features.reshape(features.shape[0], features.shape[1], -1)
    bsz, n_views, _ = features.shape
    features = features.astype(jnp.float32)
    if labels is None and mask is None:
        base_mask = jnp.eye(bsz, dtype=jnp.float32)
    elif labels is not None:
        labels = jnp.asarray(labels).reshape(-1, 1)
        base_mask = (labels == labels.T).astype(jnp.float32)
    else:
        base_mask = jnp.asarray(mask, dtype=jnp.float32)

    contrast = features.transpose(1, 0, 2).reshape(n_views * bsz, -1)
    if contrast_mode == 'one':
        anchor, anchor_count = features[:, 0], 1
    else:
        anchor, anchor_count = contrast, n_views

    adc = (anchor @ contrast.T) / temperature
    logits = adc - jnp.max(adc, axis=1, keepdims=True)
    m = jnp.tile(base_mask, (anchor_count, n_views))
    n_anchor = anchor_count * bsz
    lm = jnp.ones_like(m).at[jnp.arange(n_anchor), jnp.arange(n_anchor)].set(0.0)
    m = m * lm
    exp_logits = jnp.exp(logits) * lm
    log_prob = logits - jnp.log(jnp.sum(exp_logits, axis=1, keepdims=True))
    mlpp = jnp.sum(m * log_prob, axis=1) / jnp.sum(m, axis=1)
    loss = -(temperature / base_temperature) * mlpp
    return jnp.mean(loss)


if __name__ == "__main__":
    key = jax.random.PRNGKey(0)
    k1, k2 = jax.random.split(key)

    bsz, n_views, dim = 8, 2, 32
    features = jax.random.normal(k1, (bsz, n_views, dim), dtype=jnp.float32)
    # L2-normalize as is typical for SupCon inputs.
    features = features / jnp.linalg.norm(features, axis=-1, keepdims=True)
    labels = jax.random.randint(k2, (bsz,), 0, 3)

    # Supervised ('all'), unsupervised SimCLR, and 'one'-anchor mode.
    # Tolerance accounts for bf16 MXU inputs (f32 accumulation) in the kernel.
    cases = [
        dict(labels=labels),
        dict(),
        dict(labels=labels, contrast_mode='one'),
    ]
    for kw in cases:
        out = jax.block_until_ready(supcon_loss_pair(features, **kw))
        ref = _reference_loss(features, **kw)
        assert jnp.allclose(out, ref, rtol=2e-2, atol=2e-2), (kw, out, ref)

    print("KERNEL_OK")
</pallas_src>

<mosaic_0001>
module attributes {stable_mosaic.version = 11 : i64} {
  func.func @_supcon_kernel(%arg0: i32, %arg1: memref<128x128xbf16, #tpu.memory_space<vmem>>, %arg2: memref<128x1xi32, #tpu.memory_space<vmem>>, %arg3: memref<1x128xi32, #tpu.memory_space<vmem>>, %arg4: memref<128x1xf32, #tpu.memory_space<vmem>>) attributes {dimension_semantics = [#tpu.dimension_semantics<parallel>], iteration_bounds = array<i64: 1>, scalar_prefetch = 0 : i64, scratch_operands = 0 : i64, tpu.core_type = #tpu.core_type<tc>, window_params = [{pipeline_mode = #tpu.pipeline_mode<synchronous>, transform_indices = @transform_0, window_bounds = array<i64: 128, 128>}, {transform_indices = @transform_1, window_bounds = array<i64: 128, 1>}, {pipeline_mode = #tpu.pipeline_mode<synchronous>, transform_indices = @transform_2, window_bounds = array<i64: 1, 128>}, {transform_indices = @transform_3, window_bounds = array<i64: 128, 1>}]} {
    %c128_i32 = arith.constant 128 : i32
    %0 = arith.muli %arg0, %c128_i32 : i32
    %1 = tpu.assume_multiple %0, 128 : i32
    %2 = arith.index_cast %1 : i32 to index
    %c0 = arith.constant 0 : index
    %3 = vector.load %arg1[%2, %c0] : memref<128x128xbf16, #tpu.memory_space<vmem>>, vector<128x128xbf16>
    %c0_0 = arith.constant 0 : index
    %c0_1 = arith.constant 0 : index
    %4 = vector.load %arg1[%c0_0, %c0_1] : memref<128x128xbf16, #tpu.memory_space<vmem>>, vector<128x128xbf16>
    %cst = arith.constant dense<0.000000e+00> : vector<128x128xf32>
    %5 = tpu.matmul %3, %4, %cst {dimension_numbers = #tpu.dot_dimension_numbers<[1], [1], [0], [0], [0, 0, 1, 0], [], []>} : vector<128x128xbf16>, vector<128x128xbf16>, vector<128x128xf32> -> vector<128x128xf32>
    %cst_2 = arith.constant 20.60993 : f32
    %6 = vector.broadcast %cst_2 : f32 to vector<128x128xf32>
    %7 = arith.mulf %5, %6 : vector<128x128xf32>
    %c128_i32_3 = arith.constant 128 : i32
    %8 = arith.muli %arg0, %c128_i32_3 : i32
    %9 = tpu.iota {dimensions = array<i32: 0>} : vector<128x1xi32>
    %10 = vector.broadcast %8 : i32 to vector<128x1xi32>
    %11 = arith.addi %10, %9 : vector<128x1xi32>
    %12 = tpu.iota {dimensions = array<i32: 1>} : vector<1x128xi32>
    %13 = vector.broadcast %11 : vector<128x1xi32> to vector<128x128xi32>
    %14 = vector.broadcast %12 : vector<1x128xi32> to vector<128x128xi32>
    %15 = arith.cmpi ne, %13, %14 : vector<128x128xi32>
    %c16_i32 = arith.constant 16 : i32
    %16 = vector.broadcast %c16_i32 : i32 to vector<1x128xi32>
    %17 = arith.cmpi slt, %12, %16 : vector<1x128xi32>
    %18 = vector.broadcast %17 : vector<1x128xi1> to vector<128x128xi1>
    %19 = arith.andi %15, %18 : vector<128x128xi1>
    %c0_4 = arith.constant 0 : index
    %c0_5 = arith.constant 0 : index
    %20 = vector.load %arg2[%c0_4, %c0_5] : memref<128x1xi32, #tpu.memory_space<vmem>>, vector<128x1xi32>
    %c0_6 = arith.constant 0 : index
    %c0_7 = arith.constant 0 : index
    %21 = vector.load %arg3[%c0_6, %c0_7] : memref<1x128xi32, #tpu.memory_space<vmem>>, vector<1x128xi32>
    %22 = vector.broadcast %20 : vector<128x1xi32> to vector<128x128xi32>
    %23 = vector.broadcast %21 : vector<1x128xi32> to vector<128x128xi32>
    %24 = arith.cmpi eq, %22, %23 : vector<128x128xi32>
    %25 = arith.andi %24, %19 : vector<128x128xi1>
    %cst_8 = arith.constant dense<0xFF800000> : vector<128xf32>
    %26 = vector.multi_reduction <maximumf>, %7, %cst_8 [1] : vector<128x128xf32> to vector<128xf32>
    %27 = vector.shape_cast %26 : vector<128xf32> to vector<128x1xf32>
    %28 = vector.broadcast %27 : vector<128x1xf32> to vector<128x128xf32>
    %29 = arith.subf %7, %28 : vector<128x128xf32>
    %30 = math.exp2 %29 : vector<128x128xf32>
    %cst_9 = arith.constant 0.000000e+00 : f32
    %31 = vector.broadcast %cst_9 : f32 to vector<128x128xf32>
    %32 = arith.select %19, %30, %31 : vector<128x128xi1>, vector<128x128xf32>
    %cst_10 = arith.constant dense<0.000000e+00> : vector<128xf32>
    %33 = vector.multi_reduction <add>, %32, %cst_10 [1] : vector<128x128xf32> to vector<128xf32>
    %34 = vector.shape_cast %33 : vector<128xf32> to vector<128x1xf32>
    %cst_11 = arith.constant 0.000000e+00 : f32
    %35 = vector.broadcast %cst_11 : f32 to vector<128x128xf32>
    %36 = arith.select %25, %29, %35 : vector<128x128xi1>, vector<128x128xf32>
    %cst_12 = arith.constant dense<0.000000e+00> : vector<128xf32>
    %37 = vector.multi_reduction <add>, %36, %cst_12 [1] : vector<128x128xf32> to vector<128xf32>
    %38 = vector.shape_cast %37 : vector<128xf32> to vector<128x1xf32>
    %39 = arith.extui %25 : vector<128x128xi1> to vector<128x128xi32>
    %cst_13 = arith.constant dense<0> : vector<128xi32>
    %40 = vector.multi_reduction <add>, %39, %cst_13 [1] : vector<128x128xi32> to vector<128xi32>
    %41 = vector.shape_cast %40 : vector<128xi32> to vector<128x1xi32>
    %42 = arith.sitofp %41 : vector<128x1xi32> to vector<128x1xf32>
    %cst_14 = arith.constant 1.000000e+00 : f32
    %43 = vector.broadcast %cst_14 : f32 to vector<128x1xf32>
    %44 = arith.maximumf %42, %43 : vector<128x1xf32>
    %45 = arith.divf %38, %44 : vector<128x1xf32>
    %46 = math.log %34 : vector<128x1xf32>
    %cst_15 = arith.constant 2.000000e+00 : f32
    %47 = math.log %cst_15 : f32
    %48 = vector.broadcast %47 : f32 to vector<128x1xf32>
    %49 = arith.divf %46, %48 : vector<128x1xf32>
    %50 = arith.subf %45, %49 : vector<128x1xf32>
    %c16_i32_16 = arith.constant 16 : i32
    %51 = vector.broadcast %c16_i32_16 : i32 to vector<128x1xi32>
    %52 = arith.cmpi slt, %11, %51 : vector<128x1xi32>
    %cst_17 = arith.constant -0.693147182 : f32
    %53 = vector.broadcast %cst_17 : f32 to vector<128x1xf32>
    %54 = arith.mulf %53, %50 : vector<128x1xf32>
    %cst_18 = arith.constant 0.000000e+00 : f32
    %55 = vector.broadcast %cst_18 : f32 to vector<128x1xf32>
    %56 = arith.select %52, %54, %55 : vector<128x1xi1>, vector<128x1xf32>
    %c0_19 = arith.constant 0 : index
    %c0_20 = arith.constant 0 : index
    %57 = vector.load %arg4[%c0_19, %c0_20] : memref<128x1xf32, #tpu.memory_space<vmem>>, vector<128x1xf32>
    tpu.vector_store %arg4[%c0_19, %c0_20], %56 {strides = array<i32>} : memref<128x1xf32, #tpu.memory_space<vmem>>, vector<128x1xf32>,
    return
  }
  func.func @transform_0(%arg0: i32) -> (i32, i32) {
    %c0_i32 = arith.constant 0 : i32
    %c0_i32_0 = arith.constant 0 : i32
    %c0_i32_1 = arith.constant 0 : i32
    return %c0_i32, %c0_i32_0 : i32, i32
  }
  func.func @transform_1(%arg0: i32) -> (i32, i32) {
    %c0_i32 = arith.constant 0 : i32
    %c0_i32_0 = arith.constant 0 : i32
    return %arg0, %c0_i32 : i32, i32
  }
  func.func @transform_2(%arg0: i32) -> (i32, i32) {
    %c0_i32 = arith.constant 0 : i32
    %c0_i32_0 = arith.constant 0 : i32
    %c0_i32_1 = arith.constant 0 : i32
    return %c0_i32, %c0_i32_0 : i32, i32
  }
  func.func @transform_3(%arg0: i32) -> (i32, i32) {
    %c0_i32 = arith.constant 0 : i32
    %c0_i32_0 = arith.constant 0 : i32
    return %arg0, %c0_i32 : i32, i32
  }
}

module attributes {stable_mosaic.version = 11 : i64} {
  func.func @_supcon_kernel(%arg0: i32, %arg1: memref<128x128xbf16, #tpu.memory_space<vmem>>, %arg2: memref<128x1xi32, #tpu.memory_space<vmem>>, %arg3: memref<1x128xi32, #tpu.memory_space<vmem>>, %arg4: memref<128x1xf32, #tpu.memory_space<vmem>>) attributes {dimension_semantics = [#tpu.dimension_semantics<parallel>], iteration_bounds = array<i64: 1>, scalar_prefetch = 0 : i64, scratch_operands = 0 : i64, tpu.core_type = #tpu.core_type<tc>, window_params = [{pipeline_mode = #tpu.pipeline_mode<synchronous>, transform_indices = @transform_0, window_bounds = array<i64: 128, 128>}, {transform_indices = @transform_1, window_bounds = array<i64: 128, 1>}, {pipeline_mode = #tpu.pipeline_mode<synchronous>, transform_indices = @transform_2, window_bounds = array<i64: 1, 128>}, {transform_indices = @transform_3, window_bounds = array<i64: 128, 1>}]} {
    %c128_i32 = arith.constant 128 : i32
    %0 = arith.muli %arg0, %c128_i32 : i32
    %1 = tpu.assume_multiple %0, 128 : i32
    %2 = arith.index_cast %1 : i32 to index
    %c0 = arith.constant 0 : index
    %3 = vector.load %arg1[%2, %c0] : memref<128x128xbf16, #tpu.memory_space<vmem>>, vector<128x128xbf16>
    %c0_0 = arith.constant 0 : index
    %c0_1 = arith.constant 0 : index
    %4 = vector.load %arg1[%c0_0, %c0_1] : memref<128x128xbf16, #tpu.memory_space<vmem>>, vector<128x128xbf16>
    %cst = arith.constant dense<0.000000e+00> : vector<128x128xf32>
    %5 = tpu.matmul %3, %4, %cst {dimension_numbers = #tpu.dot_dimension_numbers<[1], [1], [0], [0], [0, 0, 1, 0], [], []>} : vector<128x128xbf16>, vector<128x128xbf16>, vector<128x128xf32> -> vector<128x128xf32>
    %cst_2 = arith.constant 20.60993 : f32
    %6 = vector.broadcast %cst_2 : f32 to vector<128x128xf32>
    %7 = arith.mulf %5, %6 : vector<128x128xf32>
    %c128_i32_3 = arith.constant 128 : i32
    %8 = arith.muli %arg0, %c128_i32_3 : i32
    %9 = tpu.iota {dimensions = array<i32: 0>} : vector<128x1xi32>
    %10 = vector.broadcast %8 : i32 to vector<128x1xi32>
    %11 = arith.addi %10, %9 : vector<128x1xi32>
    %12 = tpu.iota {dimensions = array<i32: 1>} : vector<1x128xi32>
    %13 = vector.broadcast %11 : vector<128x1xi32> to vector<128x128xi32>
    %14 = vector.broadcast %12 : vector<1x128xi32> to vector<128x128xi32>
    %15 = arith.cmpi ne, %13, %14 : vector<128x128xi32>
    %c16_i32 = arith.constant 16 : i32
    %16 = vector.broadcast %c16_i32 : i32 to vector<1x128xi32>
    %17 = arith.cmpi slt, %12, %16 : vector<1x128xi32>
    %18 = vector.broadcast %17 : vector<1x128xi1> to vector<128x128xi1>
    %19 = arith.andi %15, %18 : vector<128x128xi1>
    %c0_4 = arith.constant 0 : index
    %c0_5 = arith.constant 0 : index
    %20 = vector.load %arg2[%c0_4, %c0_5] : memref<128x1xi32, #tpu.memory_space<vmem>>, vector<128x1xi32>
    %c0_6 = arith.constant 0 : index
    %c0_7 = arith.constant 0 : index
    %21 = vector.load %arg3[%c0_6, %c0_7] : memref<1x128xi32, #tpu.memory_space<vmem>>, vector<1x128xi32>
    %22 = vector.broadcast %20 : vector<128x1xi32> to vector<128x128xi32>
    %23 = vector.broadcast %21 : vector<1x128xi32> to vector<128x128xi32>
    %24 = arith.cmpi eq, %22, %23 : vector<128x128xi32>
    %25 = arith.andi %24, %19 : vector<128x128xi1>
    %cst_8 = arith.constant dense<0xFF800000> : vector<128xf32>
    %26 = vector.multi_reduction <maximumf>, %7, %cst_8 [1] : vector<128x128xf32> to vector<128xf32>
    %27 = vector.shape_cast %26 : vector<128xf32> to vector<128x1xf32>
    %28 = vector.broadcast %27 : vector<128x1xf32> to vector<128x128xf32>
    %29 = arith.subf %7, %28 : vector<128x128xf32>
    %30 = math.exp2 %29 : vector<128x128xf32>
    %cst_9 = arith.constant 0.000000e+00 : f32
    %31 = vector.broadcast %cst_9 : f32 to vector<128x128xf32>
    %32 = arith.select %19, %30, %31 : vector<128x128xi1>, vector<128x128xf32>
    %cst_10 = arith.constant dense<0.000000e+00> : vector<128xf32>
    %33 = vector.multi_reduction <add>, %32, %cst_10 [1] : vector<128x128xf32> to vector<128xf32>
    %34 = vector.shape_cast %33 : vector<128xf32> to vector<128x1xf32>
    %cst_11 = arith.constant 0.000000e+00 : f32
    %35 = vector.broadcast %cst_11 : f32 to vector<128x128xf32>
    %36 = arith.select %25, %29, %35 : vector<128x128xi1>, vector<128x128xf32>
    %cst_12 = arith.constant dense<0.000000e+00> : vector<128xf32>
    %37 = vector.multi_reduction <add>, %36, %cst_12 [1] : vector<128x128xf32> to vector<128xf32>
    %38 = vector.shape_cast %37 : vector<128xf32> to vector<128x1xf32>
    %39 = arith.extui %25 : vector<128x128xi1> to vector<128x128xi32>
    %cst_13 = arith.constant dense<0> : vector<128xi32>
    %40 = vector.multi_reduction <add>, %39, %cst_13 [1] : vector<128x128xi32> to vector<128xi32>
    %41 = vector.shape_cast %40 : vector<128xi32> to vector<128x1xi32>
    %42 = arith.sitofp %41 : vector<128x1xi32> to vector<128x1xf32>
    %cst_14 = arith.constant 1.000000e+00 : f32
    %43 = vector.broadcast %cst_14 : f32 to vector<128x1xf32>
    %44 = arith.maximumf %42, %43 : vector<128x1xf32>
    %45 = arith.divf %38, %44 : vector<128x1xf32>
    %46 = math.log %34 : vector<128x1xf32>
    %cst_15 = arith.constant 2.000000e+00 : f32
    %47 = math.log %cst_15 : f32
    %48 = vector.broadcast %47 : f32 to vector<128x1xf32>
    %49 = arith.divf %46, %48 : vector<128x1xf32>
    %50 = arith.subf %45, %49 : vector<128x1xf32>
    %c16_i32_16 = arith.constant 16 : i32
    %51 = vector.broadcast %c16_i32_16 : i32 to vector<128x1xi32>
    %52 = arith.cmpi slt, %11, %51 : vector<128x1xi32>
    %cst_17 = arith.constant -0.693147182 : f32
    %53 = vector.broadcast %cst_17 : f32 to vector<128x1xf32>
    %54 = arith.mulf %53, %50 : vector<128x1xf32>
    %cst_18 = arith.constant 0.000000e+00 : f32
    %55 = vector.broadcast %cst_18 : f32 to vector<128x1xf32>
    %56 = arith.select %52, %54, %55 : vector<128x1xi1>, vector<128x1xf32>
    %c0_19 = arith.constant 0 : index
    %c0_20 = arith.constant 0 : index
    %57 = vector.load %arg4[%c0_19, %c0_20] : memref<128x1xf32, #tpu.memory_space<vmem>>, vector<128x1xf32>
    tpu.vector_store %arg4[%c0_19, %c0_20], %56 {strides = array<i32>} : memref<128x1xf32, #tpu.memory_space<vmem>>, vector<128x1xf32>,
    return
  }
  func.func @transform_0(%arg0: i32) -> (i32, i32) {
    %c0_i32 = arith.constant 0 : i32
    %c0_i32_0 = arith.constant 0 : i32
    %c0_i32_1 = arith.constant 0 : i32
    return %c0_i32, %c0_i32_0 : i32, i32
  }
  func.func @transform_1(%arg0: i32) -> (i32, i32) {
    %c0_i32 = arith.constant 0 : i32
    %c0_i32_0 = arith.constant 0 : i32
    return %arg0, %c0_i32 : i32, i32
  }
  func.func @transform_2(%arg0: i32) -> (i32, i32) {
    %c0_i32 = arith.constant 0 : i32
    %c0_i32_0 = arith.constant 0 : i32
    %c0_i32_1 = arith.constant 0 : i32
    return %c0_i32, %c0_i32_0 : i32, i32
  }
  func.func @transform_3(%arg0: i32) -> (i32, i32) {
    %c0_i32 = arith.constant 0 : i32
    %c0_i32_0 = arith.constant 0 : i32
    return %arg0, %c0_i32 : i32, i32
  }
}

</mosaic_0001>

<bundles_post_ra>
// kernel: tpu_custom_call.1
= control target key start
LH: loop header
LB: loop body
LE: loop exit
PB: predicated region body
PF: predicated region fallthrough
CT: control target
= control target key end

     0   :  { %v1286_v6 = vmov 0   ;;  %v212_v12 = vlaneseq  ;;  %vm1140_vm9 = vcmask 7168   ;;  %s1462_s0 = inlined_call_operand.vmem [shape: bf16[128,128], index: 0, kind: input, shape index: {}]   ;;  %s1463_s1 = inlined_call_operand.vmem [shape: s32[128,1], index: 1, kind: input, shape index: {}]   ;;  %s1464_s2 = inlined_call_operand.vmem [shape: s32[1,128], index: 2, kind: input, shape index: {}]   ;;  %s1465_s3 = inlined_call_operand.vmem [shape: f32[128,1], index: 3, kind: output, shape index: {}]  }
   0x1   :  { %v1242_v0 = vld [vmem:[%s1462_s0 + $0x38] sm:$0xff]  ;;  %v1241_v1 = vld [vmem:[%s1462_s0 + $0x30] sm:$0xff]  ;;  %v1240_v2 = vld [vmem:[%s1462_s0 + $0x28] sm:$0xff]  ;;  %1270 = vset.pattern.permute.xlu0 %v1286_v6 }
   0x2   :  { %147 = vmatpush.bf16.xpose.msra.mxu0 %v1242_v0  ;;  %1244 = vmatpush.bf16.xpose.msra.mxu2 %v1242_v0  ;;  %v1239_v3 = vld [vmem:[%s1462_s0 + $0x20] sm:$0xff]  ;;  %v1238_v4 = vld [vmem:[%s1462_s0 + $0x18] sm:$0xff]  ;;  %v1237_v7 = vld [vmem:[%s1462_s0 + $0x10] sm:$0xff]  ;;  %v213_v15 = vshrl.u32 %v212_v12, 7  ;;  %v247_v16 = vand.u32 127, %v212_v12 }
   0x3   :  { %1245 = vmatpush.bf16.xpose.msra.mxu3 %v1242_v0  ;;  %1243 = vmatpush.bf16.xpose.msra.mxu1 %v1242_v0  ;;  %v283_v5 = vld [vmem:[%s1463_s1] sm:$0xff]  ;;  %v284_v8 = vld [vmem:[%s1463_s1 + $0x8] sm:$0xff]  ;;  %v1233_v26 = vld [vmem:[%s1462_s0 + $0x30] sm:$0xff] }
   0x4   :  { %301 = vperm.xlu0 %1270, %v283_v5   ;;  %v1236_v9 = vld [vmem:[%s1462_s0 + $0x8] sm:$0xff]  ;;  %v1235_v10 = vld [vmem:[%s1462_s0] sm:$0xff]  ;;  %vm248_vm1 = vcmp.ne.s32.totalorder %v213_v15, %v247_v16  ;;  %vm264_vm2 = vcmp.lt.s32.totalorder %v247_v16, 16  ;;  %v214_v17 = vadd.s32 8, %v213_v15  ;;  %v1229_v27 = vld [vmem:[%s1462_s0 + $0x10] sm:$0xff] }
   0x5   :  { %v1227_v11 = vld [vmem:[%s1462_s0] sm:$0xff]  ;;  %vm1345_vm3 = vmand %vm248_vm1, %vm264_vm2  ;;  %v1232_v40 = vld [vmem:[%s1462_s0 + $0x28] sm:$0xff] }
   0x6   :  { %v1271_v13 = vld [vmem:[%s1464_s2] ss:$0 sm:$0xff]  ;;  %vm249_vm5 = vcmp.ne.s32.totalorder %v214_v17, %v247_v16  ;;  %v1234_v41 = vld [vmem:[%s1462_s0 + $0x38] sm:$0xff]  ;;  %v1228_v42 = vld [vmem:[%s1462_s0 + $0x8] sm:$0xff]  ;;  %v1288_v16 = vmov 0.6931472  }
   0x7   :  { %vm1357_vm6 = vmand %vm249_vm5, %vm264_vm2  ;;  %v1231_v25 = vld [vmem:[%s1462_s0 + $0x20] sm:$0xff]  ;;  %v1230_v43 = vld [vmem:[%s1462_s0 + $0x18] sm:$0xff] }
   0xa   :  { %148 = vmatpush.bf16.xpose.msra.mxu0 %v1241_v1  ;;  %1247 = vmatpush.bf16.xpose.msra.mxu2 %v1241_v1 }
   0xb   :  { %1248 = vmatpush.bf16.xpose.msra.mxu3 %v1241_v1  ;;  %1246 = vmatpush.bf16.xpose.msra.mxu1 %v1241_v1 }
   0xc   :  { %304 = vperm.xlu0 %1270, %v284_v8  }
  0x12   :  { %149 = vmatpush.bf16.xpose.msra.mxu0 %v1240_v2  ;;  %1250 = vmatpush.bf16.xpose.msra.mxu2 %v1240_v2 }
  0x13   :  { %1251 = vmatpush.bf16.xpose.msra.mxu3 %v1240_v2  ;;  %1249 = vmatpush.bf16.xpose.msra.mxu1 %v1240_v2 }
  0x1a   :  { %150 = vmatpush.bf16.xpose.msra.mxu0 %v1239_v3  ;;  %1253 = vmatpush.bf16.xpose.msra.mxu2 %v1239_v3 }
  0x1b   :  { %1254 = vmatpush.bf16.xpose.msra.mxu3 %v1239_v3  ;;  %1252 = vmatpush.bf16.xpose.msra.mxu1 %v1239_v3 }
  0x22   :  { %151 = vmatpush.bf16.xpose.msra.mxu0 %v1238_v4  ;;  %1256 = vmatpush.bf16.xpose.msra.mxu2 %v1238_v4 }
  0x23   :  { %1257 = vmatpush.bf16.xpose.msra.mxu3 %v1238_v4  ;;  %1255 = vmatpush.bf16.xpose.msra.mxu1 %v1238_v4 }
  0x2a   :  { %152 = vmatpush.bf16.xpose.msra.mxu0 %v1237_v7  ;;  %1259 = vmatpush.bf16.xpose.msra.mxu2 %v1237_v7 }
  0x2b   :  { %1260 = vmatpush.bf16.xpose.msra.mxu3 %v1237_v7  ;;  %1258 = vmatpush.bf16.xpose.msra.mxu1 %v1237_v7 }
  0x32   :  { %153 = vmatpush.bf16.xpose.msra.mxu0 %v1236_v9  ;;  %1262 = vmatpush.bf16.xpose.msra.mxu2 %v1236_v9 }
  0x33   :  { %1263 = vmatpush.bf16.xpose.msra.mxu3 %v1236_v9  ;;  %1261 = vmatpush.bf16.xpose.msra.mxu1 %v1236_v9 }
  0x3a   :  { %154 = vmatpush.bf16.xpose.msra.mxu0 %v1235_v10  ;;  %1265 = vmatpush.bf16.xpose.msra.mxu2 %v1235_v10 }
  0x3b   :  { %1266 = vmatpush.bf16.xpose.msra.mxu3 %v1235_v10  ;;  %1264 = vmatpush.bf16.xpose.msra.mxu1 %v1235_v10 }
  0x41   :  { %155 = vmatmul.bf16.vlgmr.msra.gmra.mxu0 %v1227_v11  ;;  %175 = vmatmul.bf16.vlgmr.msra.gmra.mxu2 %v1231_v25 }
  0x42   :  { %185 = vmatmul.bf16.vlgmr.msra.gmra.mxu3 %v1233_v26  ;;  %165 = vmatmul.bf16.vlgmr.msra.gmra.mxu1 %v1229_v27 }
  0x51   :  { %180 = vmatmul.bf16.gmra.mxu2 %v1232_v40  ;;  %160 = vmatmul.bf16.gmra.mxu0 %v1228_v42 }
  0x52   :  { %190 = vmatmul.bf16.gmra.mxu3 %v1234_v41  ;;  %170 = vmatmul.bf16.gmra.mxu1 %v1230_v43 }
  0x76   :  { %v302_v14 = vpop.permute.xlu0 %301 }
  0x77   :  { %vm349_vm0 = vcmp.eq.s32.totalorder %v302_v14, %v1271_v13  ;;  %v1287_v14 = vmov 0.0  }
  0x78   :  { %vm1351_vm4 = vmand %vm349_vm0, %vm1345_vm3  ;;  %1143 = vst.msk [vmem:[%s1465_s3 + $0x10] sm:$0xff] %vm1140_vm9, %v1287_v14 }
  0x79   :  { %v541_v20 = vsel %vm1351_vm4, 1, %v1286_v6  ;;  %1144 = vst.msk [vmem:[%s1465_s3 + $0x18] sm:$0xff] %vm1140_vm9, %v1287_v14 }
  0x7a   :  { %v558_v22 = vshrl.u32 %v541_v20, 16  ;;  %v557_v24 = vand.u32 65535, %v541_v20  ;;  %1145 = vst.msk [vmem:[%s1465_s3 + $0x20] sm:$0xff] %vm1140_vm9, %v1287_v14 }
  0x7b   :  { %1146 = vst.msk [vmem:[%s1465_s3 + $0x28] sm:$0xff] %vm1140_vm9, %v1287_v14 }
  0x7c   :  { %v560_v28 = vcvt.s32.f32 %v558_v22  ;;  %v559_v30 = vcvt.s32.f32 %v557_v24  ;;  %1147 = vst.msk [vmem:[%s1465_s3 + $0x30] sm:$0xff] %vm1140_vm9, %v1287_v14 }
  0x7d   :  { %1148 = vst.msk [vmem:[%s1465_s3 + $0x38] sm:$0xff] %vm1140_vm9, %v1287_v14 }
  0x7e   :  { %v305_v23 = vpop.permute.xlu0 %304  ;;  %563 = vadd.xlane.f32.xlu2 %v560_v28  ;;  %561 = vadd.xlane.f32.xlu0 %v559_v30  ;;  %1149 = vst.msk [vmem:[%s1465_s3 + $0x40] sm:$0xff] %vm1140_vm9, %v1287_v14 }
  0x7f   :  { %vm350_vm7 = vcmp.eq.s32.totalorder %v305_v23, %v1271_v13  ;;  %1150 = vst.msk [vmem:[%s1465_s3 + $0x48] sm:$0xff] %vm1140_vm9, %v1287_v14 }
  0x80   :  { %vm1372_vm8 = vmand %vm350_vm7, %vm1357_vm6  ;;  %1151 = vst.msk [vmem:[%s1465_s3 + $0x50] sm:$0xff] %vm1140_vm9, %v1287_v14 }
  0x81   :  { %v542_v31 = vsel %vm1372_vm8, 1, %v1286_v6  ;;  %1152 = vst.msk [vmem:[%s1465_s3 + $0x58] sm:$0xff] %vm1140_vm9, %v1287_v14 }
  0x82   :  { %v570_v32 = vshrl.u32 %v542_v31, 16  ;;  %v569_v38 = vand.u32 65535, %v542_v31  ;;  %1153 = vst.msk [vmem:[%s1465_s3 + $0x60] sm:$0xff] %vm1140_vm9, %v1287_v14 }
  0x83   :  { %1154 = vst.msk [vmem:[%s1465_s3 + $0x68] sm:$0xff] %vm1140_vm9, %v1287_v14 }
  0x84   :  { %v572_v33 = vcvt.s32.f32 %v570_v32  ;;  %v571_v39 = vcvt.s32.f32 %v569_v38  ;;  %1155 = vst.msk [vmem:[%s1465_s3 + $0x70] sm:$0xff] %vm1140_vm9, %v1287_v14 }
  0x85   :  { %1156 = vst.msk [vmem:[%s1465_s3 + $0x78] sm:$0xff] %vm1140_vm9, %v1287_v14 }
  0x86   :  { %575 = vadd.xlane.f32.xlu2 %v572_v33 }
  0xbe   :  { %v156_v34 = vpop.f32.mrf.mxu0 }
  0xbf   :  { %v196_v35 = vmul.f32 20.60993, %v156_v34  ;;  %v166_v44 = vpop.f32.mrf.mxu1 }
  0xc1   :  { %381 = vmax.xlane.f32.xlu1 %v196_v35 }
  0xc4   :  { %v176_v47 = vpop.f32.mrf.mxu2 }
  0xc5   :  { %v186_v48 = vpop.f32.mrf.mxu3 }
  0xc6   :  { %v158_v36 = vpop.f32.mrf.mxu0 }
  0xc7   :  { %v197_v37 = vmul.f32 20.60993, %v158_v36  ;;  %v168_v49 = vpop.f32.mrf.mxu1 }
  0xc9   :  { %383 = vmax.xlane.f32.xlu1 %v197_v37 }
  0xcc   :  { %v178_v54 = vpop.f32.mrf.mxu2 }
  0xcd   :  { %v188_v55 = vpop.f32.mrf.mxu3 }
  0xce   :  { %v161_v13 = vpop.f32.mrf.mxu0 }
  0xcf   :  { %v171_v10 = vpop.f32.mrf.mxu1 }
  0xd1   :  { %573 = vadd.xlane.f32.xlu1 %v571_v39 }
  0xd4   :  { %v181_v11 = vpop.f32.mrf.mxu2 }
  0xd5   :  { %v191_v12 = vpop.f32.mrf.mxu3 }
  0xd6   :  { %v163_v21 = vpop.f32.mrf.mxu0 }
  0xd7   :  { %v173_v18 = vpop.f32.mrf.mxu1 }
  0xdc   :  { %v183_v19 = vpop.f32.mrf.mxu2 }
  0xdd   :  { %v193_v20 = vpop.f32.mrf.mxu3 }
  0xf1   :  { %v564_v60 = vpop.xlane.xlu2 %563  ;;  %v562_v62 = vpop.xlane.xlu0 %561 }
  0xf2   :  { %v566_v61 = vcvt.f32.s32 %v564_v60  ;;  %v565_v0 = vcvt.f32.s32 %v562_v62 }
  0xf4   :  { %v567_v63 = vshll.u32 %v566_v61, 16 }
  0xf6   :  { %v568_v3 = vadd.s32 %v567_v63, %v565_v0 }
  0xf8   :  { %v749_v6 = vcvt.s32.f32 %v568_v3 }
  0xf9   :  { %v576_v1 = vpop.xlane.xlu2 %575 }
  0xfa   :  { %v578_v2 = vcvt.f32.s32 %v576_v1  ;;  %v765_v8 = vmax.f32 %v749_v6, 1.0 }
  0xfc   :  { %v579_v5 = vshll.u32 %v578_v2, 16  ;;  %vm786_vm10 = vweird.f32 %v765_v8  ;;  %v792_v33 = vand.u32 2147483648, %v765_v8 }
  0xfe   :  { %v793_v38 = vor.u32 1.1754944e-38, %v792_v33 }
 0x134   :  { %v382_v45 = vpop.xlane.xlu1 %381 }
 0x135   :  { %v413_v46 = vsub.f32 %v196_v35, %v382_v45  ;;  %v790_v35 = vand.u32 2147483647, %v765_v8 }
 0x137   :  { %1272 = vpow2.f32 %v413_v46  ;;  %v493_v57 = vsel %vm1351_vm4, %v413_v46, 0.0  ;;  %vm791_vm14 = vcmp.eq.f32.partialorder %v790_v35, 8.507059e+37 }
 0x13c   :  { %v384_v50 = vpop.xlane.xlu1 %383 }
 0x13d   :  { %v1273_v51 = vpop.eup %1272  ;;  %v414_v52 = vsub.f32 %v197_v37, %v384_v50 }
 0x13e   :  { %v445_v53 = vsel %vm1345_vm3, %v1273_v51, 0.0 }
 0x13f   :  { %1274 = vpow2.f32 %v414_v52  ;;  %461 = vadd.xlane.f32.xlu2 %v445_v53  ;;  %v494_v59 = vsel %vm1372_vm8, %v414_v52, 0.0 }
 0x140   :  { %1276 = vrcp.f32 %v765_v8 }
 0x141   :  { %1278 = vrcp.f32 %v1288_v16 }
 0x144   :  { %v574_v4 = vpop.xlane.xlu1 %573 }
 0x145   :  { %v1275_v56 = vpop.eup %1274  ;;  %v577_v7 = vcvt.f32.s32 %v574_v4 }
 0x146   :  { %v446_v58 = vsel %vm1357_vm6, %v1275_v56, 0.0  ;;  %v1277_v22 = vpop.eup %1276 }
 0x147   :  { %509 = vadd.xlane.f32.xlu2 %v493_v57  ;;  %463 = vadd.xlane.f32.xlu1 %v446_v58  ;;  %v580_v9 = vadd.s32 %v579_v5, %v577_v7  ;;  %v1279_v23 = vpop.eup %1278  ;;  %v782_v24 = vmul.f32 %v1277_v22, %v765_v8  ;;  %vm787_vm11 = vweird.f32 %v1277_v22 }
 0x148   :  { %v1054_v25 = vmul.f32 0.6931472, %v1279_v23  ;;  %vm788_vm12 = vmor %vm786_vm10, %vm787_vm11  ;;  %vm1058_vm13 = vweird.f32 %v1279_v23 }
 0x149   :  { %v750_v15 = vcvt.s32.f32 %v580_v9  ;;  %v783_v26 = vsub.f32 1.0, %v782_v24 }
 0x14a   :  { %v1055_v28 = vsub.f32 1.0, %v1054_v25 }
 0x14b   :  { %v766_v17 = vmax.f32 %v750_v15, 1.0  ;;  %v784_v29 = vmul.f32 %v1277_v22, %v783_v26 }
 0x14c   :  { %v1056_v31 = vmul.f32 %v1279_v23, %v1055_v28 }
 0x14d   :  { %1280 = vrcp.f32 %v766_v17  ;;  %v785_v34 = vadd.f32 %v1277_v22, %v784_v29  ;;  %vm801_vm15 = vweird.f32 %v766_v17  ;;  %v807_v47 = vand.u32 2147483648, %v766_v17 }
 0x14e   :  { %v1057_v37 = vadd.f32 %v1279_v23, %v1056_v31  ;;  %v805_v50 = vand.u32 2147483647, %v766_v17 }
 0x14f   :  { %511 = vadd.xlane.f32.xlu1 %v494_v59  ;;  %v789_v39 = vsel %vm788_vm12, %v1277_v22, %v785_v34  ;;  %v808_v53 = vor.u32 1.1754944e-38, %v807_v47 }
 0x150   :  { %v1059_v42 = vsel %vm1058_vm13, %v1279_v23, %v1057_v37  ;;  %v794_v44 = vsel %vm791_vm14, %v793_v38, %v789_v39  ;;  %vm806_vm2 = vcmp.eq.f32.partialorder %v805_v50, 8.507059e+37 }
 0x153   :  { %v1281_v27 = vpop.eup %1280 }
 0x154   :  { %v797_v30 = vmul.f32 %v1281_v27, %v766_v17  ;;  %vm802_vm0 = vweird.f32 %v1281_v27 }
 0x155   :  { %vm803_vm1 = vmor %vm801_vm15, %vm802_vm0 }
 0x156   :  { %v798_v36 = vsub.f32 1.0, %v797_v30 }
 0x158   :  { %v799_v40 = vmul.f32 %v1281_v27, %v798_v36 }
 0x15a   :  { %v800_v49 = vadd.f32 %v1281_v27, %v799_v40 }
 0x15c   :  { %v804_v54 = vsel %vm803_vm1, %v1281_v27, %v800_v49 }
 0x15d   :  { %v809_v58 = vsel %vm806_vm2, %v808_v53, %v804_v54 }
 0x1b2   :  { %v462_v32 = vpop.xlane.xlu2 %461 }
 0x1b3   :  { %1282 = vlog2.f32 %v462_v32 }
 0x1b9   :  { %v1283_v41 = vpop.eup %1282 }
 0x1ba   :  { %v1022_v43 = vmul.f32 0.6931472, %v1283_v41  ;;  %v510_v45 = vpop.xlane.xlu2 %509  ;;  %v464_v46 = vpop.xlane.xlu1 %463 }
 0x1bb   :  { %v795_v48 = vmul.f32 %v794_v44, %v510_v45  ;;  %1284 = vlog2.f32 %v464_v46 }
 0x1bc   :  { %v1060_v51 = vmul.f32 %v1059_v42, %v1022_v43 }
 0x1be   :  { %v1076_v52 = vsub.f32 %v795_v48, %v1060_v51 }
 0x1c0   :  { %v1108_v55 = vmul.f32 -0.6931472, %v1076_v52 }
 0x1c1   :  { %v1285_v56 = vpop.eup %1284 }
 0x1c2   :  { %1141 = vst.msk [vmem:[%s1465_s3] sm:$0xff] %vm1140_vm9, %v1108_v55  ;;  %v1024_v57 = vmul.f32 0.6931472, %v1285_v56  ;;  %v512_v59 = vpop.xlane.xlu1 %511 }
 0x1c3   :  { %v810_v60 = vmul.f32 %v809_v58, %v512_v59 }
 0x1c4   :  { %v1061_v61 = vmul.f32 %v1059_v42, %v1024_v57 }
 0x1c6   :  { %v1077_v62 = vsub.f32 %v810_v60, %v1061_v61 }
 0x1c8   :  { %v1109_v63 = vmul.f32 -0.6931472, %v1077_v62 }
 0x1ca   :  { %1142 = vst.msk [vmem:[%s1465_s3 + $0x8] sm:$0xff] %vm1140_vm9, %v1109_v63 }

// kernel: tpu_custom_call.1
= control target key start
LH: loop header
LB: loop body
LE: loop exit
PB: predicated region body
PF: predicated region fallthrough
CT: control target
= control target key end

     0   :  { %v1286_v6 = vmov 0   ;;  %v212_v12 = vlaneseq  ;;  %vm1140_vm9 = vcmask 7168   ;;  %s1462_s0 = inlined_call_operand.vmem [shape: bf16[128,128], index: 0, kind: input, shape index: {}]   ;;  %s1463_s1 = inlined_call_operand.vmem [shape: s32[128,1], index: 1, kind: input, shape index: {}]   ;;  %s1464_s2 = inlined_call_operand.vmem [shape: s32[1,128], index: 2, kind: input, shape index: {}]   ;;  %s1465_s3 = inlined_call_operand.vmem [shape: f32[128,1], index: 3, kind: output, shape index: {}]  }
   0x1   :  { %v1242_v0 = vld [vmem:[%s1462_s0 + $0x38] sm:$0xff]  ;;  %v1241_v1 = vld [vmem:[%s1462_s0 + $0x30] sm:$0xff]  ;;  %v1240_v2 = vld [vmem:[%s1462_s0 + $0x28] sm:$0xff]  ;;  %1270 = vset.pattern.permute.xlu0 %v1286_v6 }
   0x2   :  { %147 = vmatpush.bf16.xpose.msra.mxu0 %v1242_v0  ;;  %1244 = vmatpush.bf16.xpose.msra.mxu2 %v1242_v0  ;;  %v1239_v3 = vld [vmem:[%s1462_s0 + $0x20] sm:$0xff]  ;;  %v1238_v4 = vld [vmem:[%s1462_s0 + $0x18] sm:$0xff]  ;;  %v1237_v7 = vld [vmem:[%s1462_s0 + $0x10] sm:$0xff]  ;;  %v213_v15 = vshrl.u32 %v212_v12, 7  ;;  %v247_v16 = vand.u32 127, %v212_v12 }
   0x3   :  { %1245 = vmatpush.bf16.xpose.msra.mxu3 %v1242_v0  ;;  %1243 = vmatpush.bf16.xpose.msra.mxu1 %v1242_v0  ;;  %v283_v5 = vld [vmem:[%s1463_s1] sm:$0xff]  ;;  %v284_v8 = vld [vmem:[%s1463_s1 + $0x8] sm:$0xff]  ;;  %v1233_v26 = vld [vmem:[%s1462_s0 + $0x30] sm:$0xff] }
   0x4   :  { %301 = vperm.xlu0 %1270, %v283_v5   ;;  %v1236_v9 = vld [vmem:[%s1462_s0 + $0x8] sm:$0xff]  ;;  %v1235_v10 = vld [vmem:[%s1462_s0] sm:$0xff]  ;;  %vm248_vm1 = vcmp.ne.s32.totalorder %v213_v15, %v247_v16  ;;  %vm264_vm2 = vcmp.lt.s32.totalorder %v247_v16, 16  ;;  %v214_v17 = vadd.s32 8, %v213_v15  ;;  %v1229_v27 = vld [vmem:[%s1462_s0 + $0x10] sm:$0xff] }
   0x5   :  { %v1227_v11 = vld [vmem:[%s1462_s0] sm:$0xff]  ;;  %vm1345_vm3 = vmand %vm248_vm1, %vm264_vm2  ;;  %v1232_v40 = vld [vmem:[%s1462_s0 + $0x28] sm:$0xff] }
   0x6   :  { %v1271_v13 = vld [vmem:[%s1464_s2] ss:$0 sm:$0xff]  ;;  %vm249_vm5 = vcmp.ne.s32.totalorder %v214_v17, %v247_v16  ;;  %v1234_v41 = vld [vmem:[%s1462_s0 + $0x38] sm:$0xff]  ;;  %v1228_v42 = vld [vmem:[%s1462_s0 + $0x8] sm:$0xff]  ;;  %v1288_v16 = vmov 0.6931472  }
   0x7   :  { %vm1357_vm6 = vmand %vm249_vm5, %vm264_vm2  ;;  %v1231_v25 = vld [vmem:[%s1462_s0 + $0x20] sm:$0xff]  ;;  %v1230_v43 = vld [vmem:[%s1462_s0 + $0x18] sm:$0xff] }
   0xa   :  { %148 = vmatpush.bf16.xpose.msra.mxu0 %v1241_v1  ;;  %1247 = vmatpush.bf16.xpose.msra.mxu2 %v1241_v1 }
   0xb   :  { %1248 = vmatpush.bf16.xpose.msra.mxu3 %v1241_v1  ;;  %1246 = vmatpush.bf16.xpose.msra.mxu1 %v1241_v1 }
   0xc   :  { %304 = vperm.xlu0 %1270, %v284_v8  }
  0x12   :  { %149 = vmatpush.bf16.xpose.msra.mxu0 %v1240_v2  ;;  %1250 = vmatpush.bf16.xpose.msra.mxu2 %v1240_v2 }
  0x13   :  { %1251 = vmatpush.bf16.xpose.msra.mxu3 %v1240_v2  ;;  %1249 = vmatpush.bf16.xpose.msra.mxu1 %v1240_v2 }
  0x1a   :  { %150 = vmatpush.bf16.xpose.msra.mxu0 %v1239_v3  ;;  %1253 = vmatpush.bf16.xpose.msra.mxu2 %v1239_v3 }
  0x1b   :  { %1254 = vmatpush.bf16.xpose.msra.mxu3 %v1239_v3  ;;  %1252 = vmatpush.bf16.xpose.msra.mxu1 %v1239_v3 }
  0x22   :  { %151 = vmatpush.bf16.xpose.msra.mxu0 %v1238_v4  ;;  %1256 = vmatpush.bf16.xpose.msra.mxu2 %v1238_v4 }
  0x23   :  { %1257 = vmatpush.bf16.xpose.msra.mxu3 %v1238_v4  ;;  %1255 = vmatpush.bf16.xpose.msra.mxu1 %v1238_v4 }
  0x2a   :  { %152 = vmatpush.bf16.xpose.msra.mxu0 %v1237_v7  ;;  %1259 = vmatpush.bf16.xpose.msra.mxu2 %v1237_v7 }
  0x2b   :  { %1260 = vmatpush.bf16.xpose.msra.mxu3 %v1237_v7  ;;  %1258 = vmatpush.bf16.xpose.msra.mxu1 %v1237_v7 }
  0x32   :  { %153 = vmatpush.bf16.xpose.msra.mxu0 %v1236_v9  ;;  %1262 = vmatpush.bf16.xpose.msra.mxu2 %v1236_v9 }
  0x33   :  { %1263 = vmatpush.bf16.xpose.msra.mxu3 %v1236_v9  ;;  %1261 = vmatpush.bf16.xpose.msra.mxu1 %v1236_v9 }
  0x3a   :  { %154 = vmatpush.bf16.xpose.msra.mxu0 %v1235_v10  ;;  %1265 = vmatpush.bf16.xpose.msra.mxu2 %v1235_v10 }
  0x3b   :  { %1266 = vmatpush.bf16.xpose.msra.mxu3 %v1235_v10  ;;  %1264 = vmatpush.bf16.xpose.msra.mxu1 %v1235_v10 }
  0x41   :  { %155 = vmatmul.bf16.vlgmr.msra.gmra.mxu0 %v1227_v11  ;;  %175 = vmatmul.bf16.vlgmr.msra.gmra.mxu2 %v1231_v25 }
  0x42   :  { %185 = vmatmul.bf16.vlgmr.msra.gmra.mxu3 %v1233_v26  ;;  %165 = vmatmul.bf16.vlgmr.msra.gmra.mxu1 %v1229_v27 }
  0x51   :  { %180 = vmatmul.bf16.gmra.mxu2 %v1232_v40  ;;  %160 = vmatmul.bf16.gmra.mxu0 %v1228_v42 }
  0x52   :  { %190 = vmatmul.bf16.gmra.mxu3 %v1234_v41  ;;  %170 = vmatmul.bf16.gmra.mxu1 %v1230_v43 }
  0x76   :  { %v302_v14 = vpop.permute.xlu0 %301 }
  0x77   :  { %vm349_vm0 = vcmp.eq.s32.totalorder %v302_v14, %v1271_v13  ;;  %v1287_v14 = vmov 0.0  }
  0x78   :  { %vm1351_vm4 = vmand %vm349_vm0, %vm1345_vm3  ;;  %1143 = vst.msk [vmem:[%s1465_s3 + $0x10] sm:$0xff] %vm1140_vm9, %v1287_v14 }
  0x79   :  { %v541_v20 = vsel %vm1351_vm4, 1, %v1286_v6  ;;  %1144 = vst.msk [vmem:[%s1465_s3 + $0x18] sm:$0xff] %vm1140_vm9, %v1287_v14 }
  0x7a   :  { %v558_v22 = vshrl.u32 %v541_v20, 16  ;;  %v557_v24 = vand.u32 65535, %v541_v20  ;;  %1145 = vst.msk [vmem:[%s1465_s3 + $0x20] sm:$0xff] %vm1140_vm9, %v1287_v14 }
  0x7b   :  { %1146 = vst.msk [vmem:[%s1465_s3 + $0x28] sm:$0xff] %vm1140_vm9, %v1287_v14 }
  0x7c   :  { %v560_v28 = vcvt.s32.f32 %v558_v22  ;;  %v559_v30 = vcvt.s32.f32 %v557_v24  ;;  %1147 = vst.msk [vmem:[%s1465_s3 + $0x30] sm:$0xff] %vm1140_vm9, %v1287_v14 }
  0x7d   :  { %1148 = vst.msk [vmem:[%s1465_s3 + $0x38] sm:$0xff] %vm1140_vm9, %v1287_v14 }
  0x7e   :  { %v305_v23 = vpop.permute.xlu0 %304  ;;  %563 = vadd.xlane.f32.xlu2 %v560_v28  ;;  %561 = vadd.xlane.f32.xlu0 %v559_v30  ;;  %1149 = vst.msk [vmem:[%s1465_s3 + $0x40] sm:$0xff] %vm1140_vm9, %v1287_v14 }
  0x7f   :  { %vm350_vm7 = vcmp.eq.s32.totalorder %v305_v23, %v1271_v13  ;;  %1150 = vst.msk [vmem:[%s1465_s3 + $0x48] sm:$0xff] %vm1140_vm9, %v1287_v14 }
  0x80   :  { %vm1372_vm8 = vmand %vm350_vm7, %vm1357_vm6  ;;  %1151 = vst.msk [vmem:[%s1465_s3 + $0x50] sm:$0xff] %vm1140_vm9, %v1287_v14 }
  0x81   :  { %v542_v31 = vsel %vm1372_vm8, 1, %v1286_v6  ;;  %1152 = vst.msk [vmem:[%s1465_s3 + $0x58] sm:$0xff] %vm1140_vm9, %v1287_v14 }
  0x82   :  { %v570_v32 = vshrl.u32 %v542_v31, 16  ;;  %v569_v38 = vand.u32 65535, %v542_v31  ;;  %1153 = vst.msk [vmem:[%s1465_s3 + $0x60] sm:$0xff] %vm1140_vm9, %v1287_v14 }
  0x83   :  { %1154 = vst.msk [vmem:[%s1465_s3 + $0x68] sm:$0xff] %vm1140_vm9, %v1287_v14 }
  0x84   :  { %v572_v33 = vcvt.s32.f32 %v570_v32  ;;  %v571_v39 = vcvt.s32.f32 %v569_v38  ;;  %1155 = vst.msk [vmem:[%s1465_s3 + $0x70] sm:$0xff] %vm1140_vm9, %v1287_v14 }
  0x85   :  { %1156 = vst.msk [vmem:[%s1465_s3 + $0x78] sm:$0xff] %vm1140_vm9, %v1287_v14 }
  0x86   :  { %575 = vadd.xlane.f32.xlu2 %v572_v33 }
  0xbe   :  { %v156_v34 = vpop.f32.mrf.mxu0 }
  0xbf   :  { %v196_v35 = vmul.f32 20.60993, %v156_v34  ;;  %v166_v44 = vpop.f32.mrf.mxu1 }
  0xc1   :  { %381 = vmax.xlane.f32.xlu1 %v196_v35 }
  0xc4   :  { %v176_v47 = vpop.f32.mrf.mxu2 }
  0xc5   :  { %v186_v48 = vpop.f32.mrf.mxu3 }
  0xc6   :  { %v158_v36 = vpop.f32.mrf.mxu0 }
  0xc7   :  { %v197_v37 = vmul.f32 20.60993, %v158_v36  ;;  %v168_v49 = vpop.f32.mrf.mxu1 }
  0xc9   :  { %383 = vmax.xlane.f32.xlu1 %v197_v37 }
  0xcc   :  { %v178_v54 = vpop.f32.mrf.mxu2 }
  0xcd   :  { %v188_v55 = vpop.f32.mrf.mxu3 }
  0xce   :  { %v161_v13 = vpop.f32.mrf.mxu0 }
  0xcf   :  { %v171_v10 = vpop.f32.mrf.mxu1 }
  0xd1   :  { %573 = vadd.xlane.f32.xlu1 %v571_v39 }
  0xd4   :  { %v181_v11 = vpop.f32.mrf.mxu2 }
  0xd5   :  { %v191_v12 = vpop.f32.mrf.mxu3 }
  0xd6   :  { %v163_v21 = vpop.f32.mrf.mxu0 }
  0xd7   :  { %v173_v18 = vpop.f32.mrf.mxu1 }
  0xdc   :  { %v183_v19 = vpop.f32.mrf.mxu2 }
  0xdd   :  { %v193_v20 = vpop.f32.mrf.mxu3 }
  0xf1   :  { %v564_v60 = vpop.xlane.xlu2 %563  ;;  %v562_v62 = vpop.xlane.xlu0 %561 }
  0xf2   :  { %v566_v61 = vcvt.f32.s32 %v564_v60  ;;  %v565_v0 = vcvt.f32.s32 %v562_v62 }
  0xf4   :  { %v567_v63 = vshll.u32 %v566_v61, 16 }
  0xf6   :  { %v568_v3 = vadd.s32 %v567_v63, %v565_v0 }
  0xf8   :  { %v749_v6 = vcvt.s32.f32 %v568_v3 }
  0xf9   :  { %v576_v1 = vpop.xlane.xlu2 %575 }
  0xfa   :  { %v578_v2 = vcvt.f32.s32 %v576_v1  ;;  %v765_v8 = vmax.f32 %v749_v6, 1.0 }
  0xfc   :  { %v579_v5 = vshll.u32 %v578_v2, 16  ;;  %vm786_vm10 = vweird.f32 %v765_v8  ;;  %v792_v33 = vand.u32 2147483648, %v765_v8 }
  0xfe   :  { %v793_v38 = vor.u32 1.1754944e-38, %v792_v33 }
 0x134   :  { %v382_v45 = vpop.xlane.xlu1 %381 }
 0x135   :  { %v413_v46 = vsub.f32 %v196_v35, %v382_v45  ;;  %v790_v35 = vand.u32 2147483647, %v765_v8 }
 0x137   :  { %1272 = vpow2.f32 %v413_v46  ;;  %v493_v57 = vsel %vm1351_vm4, %v413_v46, 0.0  ;;  %vm791_vm14 = vcmp.eq.f32.partialorder %v790_v35, 8.507059e+37 }
 0x13c   :  { %v384_v50 = vpop.xlane.xlu1 %383 }
 0x13d   :  { %v1273_v51 = vpop.eup %1272  ;;  %v414_v52 = vsub.f32 %v197_v37, %v384_v50 }
 0x13e   :  { %v445_v53 = vsel %vm1345_vm3, %v1273_v51, 0.0 }
 0x13f   :  { %1274 = vpow2.f32 %v414_v52  ;;  %461 = vadd.xlane.f32.xlu2 %v445_v53  ;;  %v494_v59 = vsel %vm1372_vm8, %v414_v52, 0.0 }
 0x140   :  { %1276 = vrcp.f32 %v765_v8 }
 0x141   :  { %1278 = vrcp.f32 %v1288_v16 }
 0x144   :  { %v574_v4 = vpop.xlane.xlu1 %573 }
 0x145   :  { %v1275_v56 = vpop.eup %1274  ;;  %v577_v7 = vcvt.f32.s32 %v574_v4 }
 0x146   :  { %v446_v58 = vsel %vm1357_vm6, %v1275_v56, 0.0  ;;  %v1277_v22 = vpop.eup %1276 }
 0x147   :  { %509 = vadd.xlane.f32.xlu2 %v493_v57  ;;  %463 = vadd.xlane.f32.xlu1 %v446_v58  ;;  %v580_v9 = vadd.s32 %v579_v5, %v577_v7  ;;  %v1279_v23 = vpop.eup %1278  ;;  %v782_v24 = vmul.f32 %v1277_v22, %v765_v8  ;;  %vm787_vm11 = vweird.f32 %v1277_v22 }
 0x148   :  { %v1054_v25 = vmul.f32 0.6931472, %v1279_v23  ;;  %vm788_vm12 = vmor %vm786_vm10, %vm787_vm11  ;;  %vm1058_vm13 = vweird.f32 %v1279_v23 }
 0x149   :  { %v750_v15 = vcvt.s32.f32 %v580_v9  ;;  %v783_v26 = vsub.f32 1.0, %v782_v24 }
 0x14a   :  { %v1055_v28 = vsub.f32 1.0, %v1054_v25 }
 0x14b   :  { %v766_v17 = vmax.f32 %v750_v15, 1.0  ;;  %v784_v29 = vmul.f32 %v1277_v22, %v783_v26 }
 0x14c   :  { %v1056_v31 = vmul.f32 %v1279_v23, %v1055_v28 }
 0x14d   :  { %1280 = vrcp.f32 %v766_v17  ;;  %v785_v34 = vadd.f32 %v1277_v22, %v784_v29  ;;  %vm801_vm15 = vweird.f32 %v766_v17  ;;  %v807_v47 = vand.u32 2147483648, %v766_v17 }
 0x14e   :  { %v1057_v37 = vadd.f32 %v1279_v23, %v1056_v31  ;;  %v805_v50 = vand.u32 2147483647, %v766_v17 }
 0x14f   :  { %511 = vadd.xlane.f32.xlu1 %v494_v59  ;;  %v789_v39 = vsel %vm788_vm12, %v1277_v22, %v785_v34  ;;  %v808_v53 = vor.u32 1.1754944e-38, %v807_v47 }
 0x150   :  { %v1059_v42 = vsel %vm1058_vm13, %v1279_v23, %v1057_v37  ;;  %v794_v44 = vsel %vm791_vm14, %v793_v38, %v789_v39  ;;  %vm806_vm2 = vcmp.eq.f32.partialorder %v805_v50, 8.507059e+37 }
 0x153   :  { %v1281_v27 = vpop.eup %1280 }
 0x154   :  { %v797_v30 = vmul.f32 %v1281_v27, %v766_v17  ;;  %vm802_vm0 = vweird.f32 %v1281_v27 }
 0x155   :  { %vm803_vm1 = vmor %vm801_vm15, %vm802_vm0 }
 0x156   :  { %v798_v36 = vsub.f32 1.0, %v797_v30 }
 0x158   :  { %v799_v40 = vmul.f32 %v1281_v27, %v798_v36 }
 0x15a   :  { %v800_v49 = vadd.f32 %v1281_v27, %v799_v40 }
 0x15c   :  { %v804_v54 = vsel %vm803_vm1, %v1281_v27, %v800_v49 }
 0x15d   :  { %v809_v58 = vsel %vm806_vm2, %v808_v53, %v804_v54 }
 0x1b2   :  { %v462_v32 = vpop.xlane.xlu2 %461 }
 0x1b3   :  { %1282 = vlog2.f32 %v462_v32 }
 0x1b9   :  { %v1283_v41 = vpop.eup %1282 }
 0x1ba   :  { %v1022_v43 = vmul.f32 0.6931472, %v1283_v41  ;;  %v510_v45 = vpop.xlane.xlu2 %509  ;;  %v464_v46 = vpop.xlane.xlu1 %463 }
 0x1bb   :  { %v795_v48 = vmul.f32 %v794_v44, %v510_v45  ;;  %1284 = vlog2.f32 %v464_v46 }
 0x1bc   :  { %v1060_v51 = vmul.f32 %v1059_v42, %v1022_v43 }
 0x1be   :  { %v1076_v52 = vsub.f32 %v795_v48, %v1060_v51 }
 0x1c0   :  { %v1108_v55 = vmul.f32 -0.6931472, %v1076_v52 }
 0x1c1   :  { %v1285_v56 = vpop.eup %1284 }
 0x1c2   :  { %1141 = vst.msk [vmem:[%s1465_s3] sm:$0xff] %vm1140_vm9, %v1108_v55  ;;  %v1024_v57 = vmul.f32 0.6931472, %v1285_v56  ;;  %v512_v59 = vpop.xlane.xlu1 %511 }
 0x1c3   :  { %v810_v60 = vmul.f32 %v809_v58, %v512_v59 }
 0x1c4   :  { %v1061_v61 = vmul.f32 %v1059_v42, %v1024_v57 }
 0x1c6   :  { %v1077_v62 = vsub.f32 %v810_v60, %v1061_v61 }
 0x1c8   :  { %v1109_v63 = vmul.f32 -0.6931472, %v1077_v62 }
 0x1ca   :  { %1142 = vst.msk [vmem:[%s1465_s3 + $0x8] sm:$0xff] %vm1140_vm9, %v1109_v63 }

</bundles_post_ra>
